<compile_context>
chip_gen: v6e
topology: v6e:2x2x1
jax: 0.10.0
libtpu: 0.0.40
codegen_flags: <defaults>
</compile_context>

<pallas_src>
import jax
import jax.numpy as jnp
from jax.experimental import pallas as pl
from jax.experimental.pallas import tpu as pltpu

D = 16        # hidden / input width (module default d=16)
OUT = 4       # 3 direction logits (softmaxed) + 1 raw movement logit


def mlp_kernel(x_ref, w1_ref, b1_ref, w2_ref, b2_ref,
               w3_ref, b3_ref, w4_ref, b4_ref, o_ref):
    # x_ref: (D, BT) bf16, batch on lanes.  Weights are W^T (out, in) bf16,
    # biases are (out, 1) f32.  All matmuls accumulate in f32 on the MXU.
    h = jnp.dot(w1_ref[...], x_ref[...],
                preferred_element_type=jnp.float32) + b1_ref[...]
    h = jnp.maximum(h, 0.0)
    h = jnp.dot(w2_ref[...], h.astype(jnp.bfloat16),
                preferred_element_type=jnp.float32) + b2_ref[...]
    h = jnp.maximum(h, 0.0)
    h = jnp.dot(w3_ref[...], h.astype(jnp.bfloat16),
                preferred_element_type=jnp.float32) + b3_ref[...]
    h = jnp.maximum(h, 0.0)

    # Final Linear(d, 4): logits is (OUT, BT)
    logits = jnp.dot(w4_ref[...], h.astype(jnp.bfloat16),
                     preferred_element_type=jnp.float32) + b4_ref[...]

    # Softmax over the 3 "direction" rows only (static slice, no iota/mask);
    # row 3 ("movement") passes through unchanged.
    d_logits = logits[:3, :]                                   # (3, BT)
    m = jnp.max(d_logits, axis=0, keepdims=True)               # (1, BT)
    e = jnp.exp(d_logits - m)
    s = jnp.sum(e, axis=0, keepdims=True)
    direction = e * pl.reciprocal(s, approx=True)              # EUP reciprocal

    o_ref[...] = jnp.concatenate([direction, logits[3:4, :]], axis=0)


def forward(x, kernel_params, *, bt=512):
    """x: (B, D) f32.  kernel_params: pre-transposed bf16 weights, (out,1) f32 biases."""
    w1, b1, w2, b2, w3, b3, w4, b4 = kernel_params
    B = x.shape[0]
    nb = pl.cdiv(B, bt)
    Bp = nb * bt

    # Transpose once in the wrapper so batch sits on the lane axis; bf16 halves
    # the dominant HBM traffic (f32 accumulation inside the kernel).
    xT = jnp.transpose(x).astype(jnp.bfloat16)                 # (D, B)
    if Bp != B:
        xT = jnp.pad(xT, ((0, 0), (0, Bp - B)))

    const = lambda shape: pl.BlockSpec(shape, lambda i: (0, 0))  # VMEM-resident

    outT = pl.pallas_call(
        mlp_kernel,
        grid=(nb,),
        in_specs=[
            pl.BlockSpec((D, bt), lambda i: (0, i)),           # x tile (pipelined)
            const((D, D)), const((D, 1)),                      # layer 1
            const((D, D)), const((D, 1)),                      # layer 2
            const((D, D)), const((D, 1)),                      # layer 3
            const((OUT, D)), const((OUT, 1)),                  # final layer
        ],
        out_specs=pl.BlockSpec((OUT, bt), lambda i: (0, i)),
        out_shape=jax.ShapeDtypeStruct((OUT, Bp), jnp.float32),
        compiler_params=pltpu.CompilerParams(
            dimension_semantics=("parallel",)),                # megacore/dual-TC shard
    )(xT, w1, b1, w2, b2, w3, b3, w4, b4)

    return jnp.transpose(outT[:, :B])                          # (B, OUT)


def make_params(key):
    # deterministic synthetic init (roughly matching nn.Linear's uniform scale)
    ks = jax.random.split(key, 8)

    def lin(kw, kb, fan_in, fan_out):
        bound = 1.0 / jnp.sqrt(fan_in)
        w = jax.random.uniform(kw, (fan_in, fan_out), jnp.float32, -bound, bound)
        b = jax.random.uniform(kb, (fan_out,), jnp.float32, -bound, bound)
        return w, b

    w1, b1 = lin(ks[0], ks[1], D, D)
    w2, b2 = lin(ks[2], ks[3], D, D)
    w3, b3 = lin(ks[4], ks[5], D, D)
    w4, b4 = lin(ks[6], ks[7], D, OUT)
    return (w1, b1, w2, b2, w3, b3, w4, b4)


def prep_kernel_params(params):
    """Transpose weights (W^T, bf16) and reshape biases to (out, 1) f32 columns."""
    w1, b1, w2, b2, w3, b3, w4, b4 = params
    t = lambda w: jnp.transpose(w).astype(jnp.bfloat16)
    c = lambda b: b.reshape(-1, 1).astype(jnp.float32)
    return (t(w1), c(b1), t(w2), c(b2), t(w3), c(b3), t(w4), c(b4))


def reference(x, params):
    w1, b1, w2, b2, w3, b3, w4, b4 = params
    h = jnp.maximum(x @ w1 + b1, 0.0)
    h = jnp.maximum(h @ w2 + b2, 0.0)
    h = jnp.maximum(h @ w3 + b3, 0.0)
    logits = h @ w4 + b4
    direction = jax.nn.softmax(logits[:, :3], axis=1)
    movement = logits[:, 3:4]
    return jnp.concatenate([direction, movement], axis=1)


if __name__ == "__main__":
    key = jax.random.PRNGKey(0)
    kx, kp = jax.random.split(key)

    B = 1000                      # exercises batch tiling + lane padding (grid=(2,))
    x = jax.random.normal(kx, (B, D), dtype=jnp.float32)
    params = make_params(kp)
    kparams = prep_kernel_params(params)

    out = jax.block_until_ready(forward(x, kparams, bt=512))
    ref = reference(x, params)

    assert out.shape == (B, OUT)
    # bf16 inputs / approx reciprocal vs. pure-f32 reference -> relaxed tolerance
    assert jnp.allclose(out, ref, atol=2e-2, rtol=2e-2), float(jnp.max(jnp.abs(out - ref)))

    print("KERNEL_OK")
</pallas_src>

<mosaic_0001>
module attributes {stable_mosaic.version = 11 : i64} {
  func.func @mlp_kernel(%arg0: i32, %arg1: memref<16x512xbf16, #tpu.memory_space<vmem>>, %arg2: memref<16x16xbf16, #tpu.memory_space<vmem>>, %arg3: memref<16x1xf32, #tpu.memory_space<vmem>>, %arg4: memref<16x16xbf16, #tpu.memory_space<vmem>>, %arg5: memref<16x1xf32, #tpu.memory_space<vmem>>, %arg6: memref<16x16xbf16, #tpu.memory_space<vmem>>, %arg7: memref<16x1xf32, #tpu.memory_space<vmem>>, %arg8: memref<4x16xbf16, #tpu.memory_space<vmem>>, %arg9: memref<4x1xf32, #tpu.memory_space<vmem>>, %arg10: memref<4x512xf32, #tpu.memory_space<vmem>>) attributes {dimension_semantics = [#tpu.dimension_semantics<parallel>], iteration_bounds = array<i64: 2>, scalar_prefetch = 0 : i64, scratch_operands = 0 : i64, tpu.core_type = #tpu.core_type<tc>, window_params = [{transform_indices = @transform_0, window_bounds = array<i64: 16, 512>}, {pipeline_mode = #tpu.pipeline_mode<synchronous>, transform_indices = @transform_1, window_bounds = array<i64: 16, 16>}, {pipeline_mode = #tpu.pipeline_mode<synchronous>, transform_indices = @transform_2, window_bounds = array<i64: 16, 1>}, {pipeline_mode = #tpu.pipeline_mode<synchronous>, transform_indices = @transform_3, window_bounds = array<i64: 16, 16>}, {pipeline_mode = #tpu.pipeline_mode<synchronous>, transform_indices = @transform_4, window_bounds = array<i64: 16, 1>}, {pipeline_mode = #tpu.pipeline_mode<synchronous>, transform_indices = @transform_5, window_bounds = array<i64: 16, 16>}, {pipeline_mode = #tpu.pipeline_mode<synchronous>, transform_indices = @transform_6, window_bounds = array<i64: 16, 1>}, {pipeline_mode = #tpu.pipeline_mode<synchronous>, transform_indices = @transform_7, window_bounds = array<i64: 4, 16>}, {pipeline_mode = #tpu.pipeline_mode<synchronous>, transform_indices = @transform_8, window_bounds = array<i64: 4, 1>}, {transform_indices = @transform_9, window_bounds = array<i64: 4, 512>}]} {
    %c0 = arith.constant 0 : index
    %c0_0 = arith.constant 0 : index
    %0 = vector.load %arg2[%c0, %c0_0] : memref<16x16xbf16, #tpu.memory_space<vmem>>, vector<16x16xbf16>
    %c0_1 = arith.constant 0 : index
    %c0_2 = arith.constant 0 : index
    %1 = vector.load %arg1[%c0_1, %c0_2] : memref<16x512xbf16, #tpu.memory_space<vmem>>, vector<16x512xbf16>
    %cst = arith.constant dense<0.000000e+00> : vector<16x512xf32>
    %2 = tpu.matmul %0, %1, %cst {dimension_numbers = #tpu.dot_dimension_numbers<[1], [0], [0], [1], [0, 0, 1, 1], [], []>} : vector<16x16xbf16>, vector<16x512xbf16>, vector<16x512xf32> -> vector<16x512xf32>
    %c0_3 = arith.constant 0 : index
    %c0_4 = arith.constant 0 : index
    %3 = vector.load %arg3[%c0_3, %c0_4] : memref<16x1xf32, #tpu.memory_space<vmem>>, vector<16x1xf32>
    %4 = vector.broadcast %3 : vector<16x1xf32> to vector<16x512xf32>
    %5 = arith.addf %2, %4 : vector<16x512xf32>
    %cst_5 = arith.constant 0.000000e+00 : f32
    %6 = vector.broadcast %cst_5 : f32 to vector<16x512xf32>
    %7 = arith.maximumf %5, %6 : vector<16x512xf32>
    %c0_6 = arith.constant 0 : index
    %c0_7 = arith.constant 0 : index
    %8 = vector.load %arg4[%c0_6, %c0_7] : memref<16x16xbf16, #tpu.memory_space<vmem>>, vector<16x16xbf16>
    %9 = arith.truncf %7 : vector<16x512xf32> to vector<16x512xbf16>
    %cst_8 = arith.constant dense<0.000000e+00> : vector<16x512xf32>
    %10 = tpu.matmul %8, %9, %cst_8 {dimension_numbers = #tpu.dot_dimension_numbers<[1], [0], [0], [1], [0, 0, 1, 1], [], []>} : vector<16x16xbf16>, vector<16x512xbf16>, vector<16x512xf32> -> vector<16x512xf32>
    %c0_9 = arith.constant 0 : index
    %c0_10 = arith.constant 0 : index
    %11 = vector.load %arg5[%c0_9, %c0_10] : memref<16x1xf32, #tpu.memory_space<vmem>>, vector<16x1xf32>
    %12 = vector.broadcast %11 : vector<16x1xf32> to vector<16x512xf32>
    %13 = arith.addf %10, %12 : vector<16x512xf32>
    %cst_11 = arith.constant 0.000000e+00 : f32
    %14 = vector.broadcast %cst_11 : f32 to vector<16x512xf32>
    %15 = arith.maximumf %13, %14 : vector<16x512xf32>
    %c0_12 = arith.constant 0 : index
    %c0_13 = arith.constant 0 : index
    %16 = vector.load %arg6[%c0_12, %c0_13] : memref<16x16xbf16, #tpu.memory_space<vmem>>, vector<16x16xbf16>
    %17 = arith.truncf %15 : vector<16x512xf32> to vector<16x512xbf16>
    %cst_14 = arith.constant dense<0.000000e+00> : vector<16x512xf32>
    %18 = tpu.matmul %16, %17, %cst_14 {dimension_numbers = #tpu.dot_dimension_numbers<[1], [0], [0], [1], [0, 0, 1, 1], [], []>} : vector<16x16xbf16>, vector<16x512xbf16>, vector<16x512xf32> -> vector<16x512xf32>
    %c0_15 = arith.constant 0 : index
    %c0_16 = arith.constant 0 : index
    %19 = vector.load %arg7[%c0_15, %c0_16] : memref<16x1xf32, #tpu.memory_space<vmem>>, vector<16x1xf32>
    %20 = vector.broadcast %19 : vector<16x1xf32> to vector<16x512xf32>
    %21 = arith.addf %18, %20 : vector<16x512xf32>
    %cst_17 = arith.constant 0.000000e+00 : f32
    %22 = vector.broadcast %cst_17 : f32 to vector<16x512xf32>
    %23 = arith.maximumf %21, %22 : vector<16x512xf32>
    %c0_18 = arith.constant 0 : index
    %c0_19 = arith.constant 0 : index
    %24 = vector.load %arg8[%c0_18, %c0_19] : memref<4x16xbf16, #tpu.memory_space<vmem>>, vector<4x16xbf16>
    %25 = arith.truncf %23 : vector<16x512xf32> to vector<16x512xbf16>
    %cst_20 = arith.constant dense<0.000000e+00> : vector<4x512xf32>
    %26 = tpu.matmul %24, %25, %cst_20 {dimension_numbers = #tpu.dot_dimension_numbers<[1], [0], [0], [1], [0, 0, 1, 1], [], []>} : vector<4x16xbf16>, vector<16x512xbf16>, vector<4x512xf32> -> vector<4x512xf32>
    %c0_21 = arith.constant 0 : index
    %c0_22 = arith.constant 0 : index
    %27 = vector.load %arg9[%c0_21, %c0_22] : memref<4x1xf32, #tpu.memory_space<vmem>>, vector<4x1xf32>
    %28 = vector.broadcast %27 : vector<4x1xf32> to vector<4x512xf32>
    %29 = arith.addf %26, %28 : vector<4x512xf32>
    %30 = vector.extract_strided_slice %29 {offsets = [0, 0], sizes = [3, 512], strides = [1, 1]} : vector<4x512xf32> to vector<3x512xf32>
    %cst_23 = arith.constant dense<0xFF800000> : vector<512xf32>
    %31 = vector.multi_reduction <maximumf>, %30, %cst_23 [0] : vector<3x512xf32> to vector<512xf32>
    %32 = vector.shape_cast %31 : vector<512xf32> to vector<1x512xf32>
    %33 = vector.broadcast %32 : vector<1x512xf32> to vector<3x512xf32>
    %34 = arith.subf %30, %33 : vector<3x512xf32>
    %35 = math.exp %34 : vector<3x512xf32>
    %cst_24 = arith.constant dense<0.000000e+00> : vector<512xf32>
    %36 = vector.multi_reduction <add>, %35, %cst_24 [0] : vector<3x512xf32> to vector<512xf32>
    %37 = vector.shape_cast %36 : vector<512xf32> to vector<1x512xf32>
    %38 = tpu.reciprocal %37 {approx = true} : vector<1x512xf32> -> vector<1x512xf32>
    %39 = vector.broadcast %38 : vector<1x512xf32> to vector<3x512xf32>
    %40 = arith.mulf %35, %39 : vector<3x512xf32>
    %41 = vector.extract_strided_slice %29 {offsets = [3, 0], sizes = [1, 512], strides = [1, 1]} : vector<4x512xf32> to vector<1x512xf32>
    %42 = tpu.concatenate %40, %41 in 0 : vector<3x512xf32>, vector<1x512xf32> -> vector<4x512xf32>
    %c0_25 = arith.constant 0 : index
    %c0_26 = arith.constant 0 : index
    %43 = vector.load %arg10[%c0_25, %c0_26] : memref<4x512xf32, #tpu.memory_space<vmem>>, vector<4x512xf32>
    tpu.vector_store %arg10[%c0_25, %c0_26], %42 {strides = array<i32>} : memref<4x512xf32, #tpu.memory_space<vmem>>, vector<4x512xf32>,
    return
  }
  func.func @transform_0(%arg0: i32) -> (i32, i32) {
    %c0_i32 = arith.constant 0 : i32
    %c0_i32_0 = arith.constant 0 : i32
    return %c0_i32, %arg0 : i32, i32
  }
  func.func @transform_1(%arg0: i32) -> (i32, i32) {
    %c0_i32 = arith.constant 0 : i32
    %c0_i32_0 = arith.constant 0 : i32
    %c0_i32_1 = arith.constant 0 : i32
    return %c0_i32, %c0_i32_0 : i32, i32
  }
  func.func @transform_2(%arg0: i32) -> (i32, i32) {
    %c0_i32 = arith.constant 0 : i32
    %c0_i32_0 = arith.constant 0 : i32
    %c0_i32_1 = arith.constant 0 : i32
    return %c0_i32, %c0_i32_0 : i32, i32
  }
  func.func @transform_3(%arg0: i32) -> (i32, i32) {
    %c0_i32 = arith.constant 0 : i32
    %c0_i32_0 = arith.constant 0 : i32
    %c0_i32_1 = arith.constant 0 : i32
    return %c0_i32, %c0_i32_0 : i32, i32
  }
  func.func @transform_4(%arg0: i32) -> (i32, i32) {
    %c0_i32 = arith.constant 0 : i32
    %c0_i32_0 = arith.constant 0 : i32
    %c0_i32_1 = arith.constant 0 : i32
    return %c0_i32, %c0_i32_0 : i32, i32
  }
  func.func @transform_5(%arg0: i32) -> (i32, i32) {
    %c0_i32 = arith.constant 0 : i32
    %c0_i32_0 = arith.constant 0 : i32
    %c0_i32_1 = arith.constant 0 : i32
    return %c0_i32, %c0_i32_0 : i32, i32
  }
  func.func @transform_6(%arg0: i32) -> (i32, i32) {
    %c0_i32 = arith.constant 0 : i32
    %c0_i32_0 = arith.constant 0 : i32
    %c0_i32_1 = arith.constant 0 : i32
    return %c0_i32, %c0_i32_0 : i32, i32
  }
  func.func @transform_7(%arg0: i32) -> (i32, i32) {
    %c0_i32 = arith.constant 0 : i32
    %c0_i32_0 = arith.constant 0 : i32
    %c0_i32_1 = arith.constant 0 : i32
    return %c0_i32, %c0_i32_0 : i32, i32
  }
  func.func @transform_8(%arg0: i32) -> (i32, i32) {
    %c0_i32 = arith.constant 0 : i32
    %c0_i32_0 = arith.constant 0 : i32
    %c0_i32_1 = arith.constant 0 : i32
    return %c0_i32, %c0_i32_0 : i32, i32
  }
  func.func @transform_9(%arg0: i32) -> (i32, i32) {
    %c0_i32 = arith.constant 0 : i32
    %c0_i32_0 = arith.constant 0 : i32
    return %c0_i32, %arg0 : i32, i32
  }
}

</mosaic_0001>

<bundles_post_ra>
// kernel: tpu_custom_call.1
= control target key start
LH: loop header
LB: loop body
LE: loop exit
PB: predicated region body
PF: predicated region fallthrough
CT: control target
= control target key end

     0   :  { %14 = vsyncpa [#allocation3], 0  ;;  %s1497_s0 = inlined_call_operand.hbm [shape: bf16[16,1024], index: 0, kind: input, shape index: {}]   ;;  %s1498_s1 = inlined_call_operand.vmem [shape: bf16[16,16], index: 1, kind: input, shape index: {}]   ;;  %s1499_s2 = inlined_call_operand.vmem [shape: f32[16,1], index: 2, kind: input, shape index: {}]   ;;  %s1500_s3 = inlined_call_operand.vmem [shape: bf16[16,16], index: 3, kind: input, shape index: {}]   ;;  %s1501_s4 = inlined_call_operand.vmem [shape: f32[16,1], index: 4, kind: input, shape index: {}]   ;;  %s1502_s5 = inlined_call_operand.vmem [shape: bf16[16,16], index: 5, kind: input, shape index: {}]   ;;  %s1503_s6 = inlined_call_operand.vmem [shape: f32[16,1], index: 6, kind: input, shape index: {}]   ;;  %s1504_s7 = inlined_call_operand.vmem [shape: bf16[4,16], index: 7, kind: input, shape index: {}]   ;;  %s1505_s8 = inlined_call_operand.vmem [shape: f32[4,1], index: 8, kind: input, shape index: {}]   ;;  %s1506_s9 = inlined_call_operand.hbm [shape: f32[4,1024], index: 9, kind: output, shape index: {}]  }
   0x1   :  { %16 = vsyncpa [#allocation3 + $0x1], 0 }
   0x2   :  { %17 = vsyncpa [#allocation4], 0 }
   0x3   :  { %19 = vsyncpa [#allocation4 + $0x1], 0  ;;  %s1265_s30 = smov 0   ;;  %s1267_s10 = smov 0  }
   0x4   :  { %s1269_s11 = smov 0   ;;  %s1271_s12 = smov 0  }
   0x5 LB: > { %1510 = sst [smem:[#allocation8_spill]] %s1203_s11  ;;  %s1286_s13 = sadd.s32 4294967295, %s1207_s12   ;;  %s1207_s12 = sphi %s1271_s12, %s1526_s12   ;;  %s1203_s11 = sphi %s1269_s11, %s1523_s11   ;;  %s1199_s10 = sphi %s1267_s10, %s1525_s10   ;;  %s1195_s30 = sphi %s1265_s30, %s1524_s30  }
   0x6   : > { %s1007_s14 = sadd.s32 4294967294, %s1207_s12   ;;  %s1290_s15 = sadd.s32 1, %s1207_s12  }
   0x7   : > { %s32_s16 = sadd.s32 1, %s1203_s11  ;;  %s29_s17 = ssub.s32 %s1207_s12, %s1290_s15 }
   0x8   : > { %p39_p0 = scmp.ne.s32.totalorder %s1203_s11, %s1199_s10  ;;  %p30_p1 = scmp.eq.s32.totalorder %s29_s17, 0 }
   0x9   : > { %p40_p2 = scmp.eq.s32.totalorder %s1207_s12, 0  ;;  %p45_p3 = scmp.ne.s32.totalorder %s1199_s10, %s1195_s30 }
   0xa   : > { %p46_p4 = scmp.eq.s32.totalorder %s1286_s13, 0  ;;  %p237_p7 = scmp.eq.s32.totalorder %s1286_s13, 1 }
   0xb   : > { %s1302_s18 = scalar_select %p30_p1, %s1203_s11, %s32_s16  }
   0xc   : > { %p1304_p5 = por %p40_p2, %p39_p0  ;;  %p1308_p6 = por %p46_p4, %p45_p3 }
   0xd   : > { %1511 = sst [smem:[#allocation9_spill]] %s1302_s18  ;;  %p243_p8 = scmp.eq.s32.totalorder %s1007_s14, 1 }
   0xe   : > { %s1513_s20 = scalar_select %p1308_p6, 1, 0 }
   0xf   : > { %p1050_p10 = scmp.lt.s32.totalorder %s1207_s12, 2  ;;  %p1315_p11 = por %p237_p7, %p39_p0 }
  0x10   : > { %p1319_p12 = por %p243_p8, %p45_p3  ;;  %s287_s23 = sand.u32 1, %s1203_s11  }
  0x11   : > { %s1514_s21 = scalar_select %p1315_p11, 1, 0 }
  0x12   : > { %s1515_s22 = scalar_select %p1319_p12, 1, 0 }
  0x13   : > { %s1036_s24 = sshll.u32 %s1207_s12, 8  ;;  %s1010_s25 = sshll.u32 %s287_s23, 5 }
  0x14   : > { %s1328_s28 = scalar_lea.hbm %s1497_s0, %s1036_s24  ;;  %s291_s29 = scalar_lea.vmem [#allocation2], %s1010_s25 }
  0x15   : > { %s298_s14 = sshll.u32 %s291_s29, 4  ;;  %p1332_p13 = pnand %p1050_p10, %p1304_p5  ;;  %s1336_s14 = int_to_ptr.vmem [resolvable:$true] %s298_s14 }
  0x16   : > { %s1339_s17 = scalar_lea.sflag [#allocation3], %s287_s23  ;;  %s1115_s18 = scalar_lea.hbm %s1328_s28, 512 }
  0x17   : > { %p1116_p1 = scmp.ne.s32.totalorder %s1328_s28, %s1115_s18  ;;  %p1117_p2 = pneg %p1332_p13 }
  0x18   : > { %s1120_s19 = scalar_lea.hbm %s1497_s0, 1024  ;;  %p1121_p5 = scmp.lt.s32.totalorder %s1328_s28, %s1497_s0 }
  0x19   : > { %p1118_p3 = pnand %p1117_p2, %p1116_p1  ;;  %p1122_p7 = scmp.lt.s32.totalorder %s1120_s19, %s1115_s18 }
  0x1b   : > { %p1119_p4 = pneg %p1118_p3  ;;  %p1123_p8 = por %p1122_p7, %p1121_p5 }
  0x1d   : > { %p1124_p10 = pnand %p1123_p8, %p1119_p4 }
  0x1f   : > { %1127 = shalt.err (!%p1124_p10)
}
  0x20   : > { %s1128_s23 = scalar_lea.vmem %s1336_s14, 512  ;;  %s1209_s29 = smov [#allocation2]  }
  0x21   : > { %p1129_p9 = scmp.ne.s32.totalorder %s1336_s14, %s1128_s23  ;;  %s1133_s11 = sshll.u32 %s1209_s29, 4  ;;  %s1134_s11 = int_to_ptr.vmem [resolvable:$false] %s1133_s11 }
  0x22   : > { %s1135_s24 = scalar_lea.vmem %s1134_s11, 1024  ;;  %p1136_p3 = scmp.lt.s32.totalorder %s1336_s14, %s1134_s11 }
  0x23   : > { %p1131_p0 = pnand %p1129_p9, %p1117_p2  ;;  %p1137_p12 = scmp.lt.s32.totalorder %s1135_s24, %s1128_s23 }
  0x25   : > { %p1132_p1 = pneg %p1131_p0  ;;  %p1138_p11 = por %p1137_p12, %p1136_p3 }
  0x27   : > { %p1139_p6 = pnand %p1138_p11, %p1132_p1 }
  0x29   : > { %1142 = shalt.err (!%p1139_p6)
}
  0x2a   : > { %s1210_s18 = smov 512   ;;  %s1211_s25 = smov 256  }
  0x2b   : > { %s1212_s19 = smov 16   ;;  %p306_p9 = scmp.lt.s32.totalorder %s1207_s12, 3 }
  0x2c   : > { %1045 = dma.hbm_to_vmem [thread:$0]  (!%p1332_p13), %s1328_s28, 512, %s1336_s14, %s1339_s17, %s1210_s18, %s1211_s25, %s1212_s19  }
  0x2d   : > { %p1517_p0 = scmp.ge.s32.totalorder %s1207_s12, 1 }
  0x2f   : > { %p307_p2 = pnand %p1517_p0, %p306_p9 }
  0x30   : > { %s1364_s11 = sand.u32 (!%p307_p2), 1, %s1199_s10   ;;  %p1518_p6 = scmp.ne.s32.totalorder (!%p307_p2), %s1513_s20, 0 }
  0x31   : > { %310 = sbr.rel (%p307_p2) target bundleno = 963 (0x3c3), region = 56  ;;  %s1014_s26 = sshll.u32 (!%p307_p2), %s1364_s11, 5 }
  0x32   : > { %s313_s27 = scalar_lea.sflag (!%p307_p2), [#allocation3], %s1364_s11  ;;  %s316_s23 = scalar_lea.vmem (!%p307_p2), [#allocation2], %s1014_s26 }
  0x36   : > { %1186 = dma.done.wait (%p1518_p6), %s313_s27, 512  }
  0x37   : > { %1188 = vsyncadd (%p1518_p6), %s313_s27, 4294966784  ;;  %v1213_v0 = vmov 0   ;;  %v1090_v1 = vld [vmem:[%s316_s23 + $0x4] ss:$16 sps:$4 sm:$0xff]   ;;  %v1092_v2 = vld [vmem:[%s316_s23 + $0xc] ss:$16 sps:$4 sm:$0xff]  }
  0x38   : > { %433 = vmatprep.mubr.bf16.mxu0 %v1213_v0  ;;  %476 = vmatprep.mubr.bf16.mxu1 %v1213_v0  ;;  %v1094_v3 = vld [vmem:[%s316_s23] ss:$16 sps:$4 sm:$0xff]   ;;  %v1095_v4 = vld [vmem:[%s316_s23 + $0x8] ss:$16 sps:$4 sm:$0xff]   ;;  %vm397_vm0 = vcmask 130048   ;;  %vm831_vm1 = vcmask 1042432  }
  0x39   : > { %1088 = vset.pattern.permute.xlu0 %v1213_v0  ;;  %1089 = vset.pattern.permute.xlu1 %v1213_v0  ;;  %v1096_v5 = vld [vmem:[%s1498_s1] sm:$0xff]   ;;  %v361_v7 = vld [vmem:[%s1499_s2 + $0x8] sm:$0xff]  ;;  %s1015_s19 = sshll.u32 %s1364_s11, 4  ;;  %s1037_s26 = sshll.u32 %s1286_s13, 8 }
  0x3a   : > { %415 = vmatprep.subr.bf16.mxu0 %v1090_v1  ;;  %458 = vmatprep.subr.bf16.mxu1 %v1092_v2  ;;  %v360_v6 = vld [vmem:[%s1499_s2] sm:$0xff]  ;;  %v502_v11 = vld [vmem:[%s1501_s4 + $0x8] sm:$0xff]  ;;  %s350_s27 = scalar_lea.vmem [#allocation5], %s1015_s19  ;;  %s1460_s13 = scalar_lea.hbm %s1506_s9, %s1037_s26 }
  0x3b   : > { %416 = vmatpush1.bf16.msra.mxu0 %v1094_v3  ;;  %459 = vmatpush1.bf16.msra.mxu1 %v1095_v4  ;;  %v621_v8 = vld [vmem:[%s1503_s6] sm:$0xff]  ;;  %v622_v12 = vld [vmem:[%s1503_s6 + $0x8] sm:$0xff]  ;;  %s937_s23 = sshll.u32 %s350_s27, 4  ;;  %s923_s20 = scalar_lea.sflag [#allocation4], %s1364_s11  ;;  %s938_s23 = int_to_ptr.vmem [resolvable:$true] %s937_s23 }
  0x3c   : > { %364 = vperm.xlu0 %1088, %v360_v6   ;;  %v740_v9 = vld [vmem:[%s1505_s8] sm:$0xf]  ;;  %s1143_s16 = scalar_lea.vmem %s938_s23, 256  ;;  %p1519_p12 = scmp.ne.s32.totalorder %s1514_s21, 0 }
  0x3d   : > { %v501_v10 = vld [vmem:[%s1501_s4] sm:$0xff]  ;;  %p1144_p11 = scmp.ne.s32.totalorder %s938_s23, %s1143_s16  ;;  %s1214_s17 = smov [#allocation5]  }
  0x3e   : > { %1021 = vmatmul.mubr.msk.bf16.vlgmr.msra.gmra.mxu0 %vm397_vm0, %v1096_v5  ;;  %1022 = vmatmul.mubr.msk.bf16.vlgmr.msra.gmra.mxu1 %vm397_vm0, %v1096_v5  ;;  %v1097_v43 = vld [vmem:[%s1500_s3] sm:$0xff]   ;;  %s1147_s29 = sshll.u32 %s1214_s17, 4  ;;  %s1148_s29 = int_to_ptr.vmem [resolvable:$false] %s1147_s29 }
  0x3f   : > { %553 = vmatprep.mubr.bf16.mxu0 %v1213_v0  ;;  %596 = vmatprep.mubr.bf16.mxu1 %v1213_v0  ;;  %p1145_p13 = pnand %p1144_p11, %p1519_p12  ;;  %s1149_s24 = scalar_lea.vmem %s1148_s29, 512 }
  0x40   : > { %369 = vperm.xlu0 %1088, %v361_v7   ;;  %505 = vperm.xlu1 %1089, %v501_v10   ;;  %p1150_p5 = scmp.lt.s32.totalorder %s938_s23, %s1148_s29  ;;  %p1151_p7 = scmp.lt.s32.totalorder %s1149_s24, %s1143_s16 }
  0x41   : > { %p1146_p4 = pneg %p1145_p13 }
  0x42   : > { %p1152_p8 = por %p1151_p7, %p1150_p5 }
  0x44   : > { %625 = vperm.xlu0 %1088, %v621_v8   ;;  %510 = vperm.xlu1 %1089, %v502_v11   ;;  %v1098_v11 = vld [vmem:[%s1502_s5] sm:$0xff]   ;;  %p1153_p10 = pnand %p1152_p8, %p1146_p4 }
  0x48   : > { %743 = vperm.xlu0 %1088, %v740_v9   ;;  %630 = vperm.xlu1 %1089, %v622_v12  }
  0xb7   : > { %v365_v13 = vpop.permute.xlu0 %364 }
  0xbb   : > { %v370_v18 = vpop.permute.xlu0 %369  ;;  %v506_v44 = vpop.permute.xlu1 %505 }
  0xbf   : > { %v511_v49 = vpop.permute.xlu1 %510 }
  0xfe   : > { %v435_v14 = vpop.f32.mrf.mxu0  ;;  %v478_v15 = vpop.f32.mrf.mxu1 }
  0xff   : > { %v436_v25 = vadd.f32 %v435_v14, %v365_v13  ;;  %v479_v26 = vadd.f32 %v478_v15, %v365_v13 }
 0x100   : > { %v437_v16 = vpop.f32.mrf.mxu0  ;;  %v480_v17 = vpop.f32.mrf.mxu1 }
 0x101   : > { %v438_v21 = vadd.f32 %v437_v16, %v365_v13  ;;  %v481_v22 = vadd.f32 %v480_v17, %v365_v13  ;;  %v487_v37 = vmax.f32 %v436_v25, 0.0  ;;  %v489_v38 = vmax.f32 %v479_v26, 0.0  ;;  %v626_v16 = vpop.permute.xlu0 %625  ;;  %v631_v17 = vpop.permute.xlu1 %630 }
 0x102   : > { %v439_v19 = vpop.f32.mrf.mxu0  ;;  %v482_v20 = vpop.f32.mrf.mxu1 }
 0x103   : > { %v440_v23 = vadd.f32 %v439_v19, %v370_v18  ;;  %v483_v24 = vadd.f32 %v482_v20, %v370_v18  ;;  %v488_v33 = vmax.f32 %v438_v21, 0.0  ;;  %v490_v34 = vmax.f32 %v481_v22, 0.0 }
 0x104   : > { %v441_v27 = vpop.f32.mrf.mxu0  ;;  %v484_v28 = vpop.f32.mrf.mxu1 }
 0x105   : > { %v442_v29 = vadd.f32 %v441_v27, %v370_v18  ;;  %v485_v30 = vadd.f32 %v484_v28, %v370_v18  ;;  %v491_v31 = vmax.f32 %v440_v23, 0.0  ;;  %v493_v32 = vmax.f32 %v483_v24, 0.0 }
 0x107   : > { %v492_v35 = vmax.f32 %v442_v29, 0.0  ;;  %v494_v36 = vmax.f32 %v485_v30, 0.0  ;;  %v497_v41 = vpack.c.bf16 %v491_v31, %v487_v37  ;;  %v499_v42 = vpack.c.bf16 %v493_v32, %v489_v38 }
 0x109   : > { %v498_v39 = vpack.c.bf16 %v492_v35, %v488_v33  ;;  %v500_v40 = vpack.c.bf16 %v494_v36, %v490_v34 }
 0x10b   : > { %535 = vmatprep.subr.bf16.mxu0 %v498_v39  ;;  %578 = vmatprep.subr.bf16.mxu1 %v500_v40 }
 0x10c   : > { %536 = vmatpush1.bf16.msra.mxu0 %v497_v41  ;;  %579 = vmatpush1.bf16.msra.mxu1 %v499_v42  ;;  %v735_v41 = vld [vmem:[%s1504_s7] sm:$0x3]  ;;  %v744_v42 = vpop.permute.xlu0 %743 }
 0x10f   : > { %1024 = vmatmul.mubr.msk.bf16.vlgmr.msra.gmra.mxu0 %vm397_vm0, %v1097_v43  ;;  %1025 = vmatmul.mubr.msk.bf16.vlgmr.msra.gmra.mxu1 %vm397_vm0, %v1097_v43 }
 0x110   : > { %673 = vmatprep.mubr.bf16.mxu0 %v1213_v0  ;;  %716 = vmatprep.mubr.bf16.mxu1 %v1213_v0 }
 0x1cf   : > { %v555_v45 = vpop.f32.mrf.mxu0  ;;  %v598_v46 = vpop.f32.mrf.mxu1 }
 0x1d0   : > { %v556_v56 = vadd.f32 %v555_v45, %v506_v44  ;;  %v599_v57 = vadd.f32 %v598_v46, %v506_v44 }
 0x1d1   : > { %v557_v47 = vpop.f32.mrf.mxu0  ;;  %v600_v48 = vpop.f32.mrf.mxu1 }
 0x1d2   : > { %v558_v52 = vadd.f32 %v557_v47, %v506_v44  ;;  %v601_v53 = vadd.f32 %v600_v48, %v506_v44  ;;  %v607_v5 = vmax.f32 %v556_v56, 0.0  ;;  %v609_v6 = vmax.f32 %v599_v57, 0.0 }
 0x1d3   : > { %v559_v50 = vpop.f32.mrf.mxu0  ;;  %v602_v51 = vpop.f32.mrf.mxu1 }
 0x1d4   : > { %v560_v54 = vadd.f32 %v559_v50, %v511_v49  ;;  %v603_v55 = vadd.f32 %v602_v51, %v511_v49  ;;  %v608_v1 = vmax.f32 %v558_v52, 0.0  ;;  %v610_v2 = vmax.f32 %v601_v53, 0.0 }
 0x1d5   : > { %v561_v58 = vpop.f32.mrf.mxu0  ;;  %v604_v59 = vpop.f32.mrf.mxu1 }
 0x1d6   : > { %v562_v60 = vadd.f32 %v561_v58, %v511_v49  ;;  %v605_v61 = vadd.f32 %v604_v59, %v511_v49  ;;  %v611_v62 = vmax.f32 %v560_v54, 0.0  ;;  %v613_v63 = vmax.f32 %v603_v55, 0.0 }
 0x1d8   : > { %v612_v3 = vmax.f32 %v562_v60, 0.0  ;;  %v614_v4 = vmax.f32 %v605_v61, 0.0  ;;  %v617_v9 = vpack.c.bf16 %v611_v62, %v607_v5  ;;  %v619_v10 = vpack.c.bf16 %v613_v63, %v609_v6 }
 0x1da   : > { %v618_v7 = vpack.c.bf16 %v612_v3, %v608_v1  ;;  %v620_v8 = vpack.c.bf16 %v614_v4, %v610_v2 }
 0x1dc   : > { %655 = vmatprep.subr.bf16.mxu0 %v618_v7  ;;  %698 = vmatprep.subr.bf16.mxu1 %v620_v8 }
 0x1dd   : > { %656 = vmatpush1.bf16.msra.mxu0 %v617_v9  ;;  %699 = vmatpush1.bf16.msra.mxu1 %v619_v10 }
 0x1e0   : > { %1027 = vmatmul.mubr.msk.bf16.vlgmr.msra.gmra.mxu0 %vm397_vm0, %v1098_v11  ;;  %1028 = vmatmul.mubr.msk.bf16.vlgmr.msra.gmra.mxu1 %vm397_vm0, %v1098_v11 }
 0x1e1   : > { %781 = vmatprep.mubr.bf16.mxu0 %v1213_v0  ;;  %822 = vmatprep.mubr.bf16.mxu1 %v1213_v0 }
 0x2a0   : > { %v675_v12 = vpop.f32.mrf.mxu0  ;;  %v718_v13 = vpop.f32.mrf.mxu1 }
 0x2a1   : > { %v676_v24 = vadd.f32 %v675_v12, %v626_v16  ;;  %v719_v25 = vadd.f32 %v718_v13, %v626_v16 }
 0x2a2   : > { %v677_v14 = vpop.f32.mrf.mxu0  ;;  %v720_v15 = vpop.f32.mrf.mxu1 }
 0x2a3   : > { %v678_v20 = vadd.f32 %v677_v14, %v626_v16  ;;  %v721_v21 = vadd.f32 %v720_v15, %v626_v16  ;;  %v727_v35 = vmax.f32 %v676_v24, 0.0  ;;  %v729_v36 = vmax.f32 %v719_v25, 0.0 }
 0x2a4   : > { %v679_v18 = vpop.f32.mrf.mxu0  ;;  %v722_v19 = vpop.f32.mrf.mxu1 }
 0x2a5   : > { %v680_v22 = vadd.f32 %v679_v18, %v631_v17  ;;  %v723_v23 = vadd.f32 %v722_v19, %v631_v17  ;;  %v728_v31 = vmax.f32 %v678_v20, 0.0  ;;  %v730_v32 = vmax.f32 %v721_v21, 0.0 }
 0x2a6   : > { %v681_v26 = vpop.f32.mrf.mxu0  ;;  %v724_v27 = vpop.f32.mrf.mxu1 }
 0x2a7   : > { %v682_v28 = vadd.f32 %v681_v26, %v631_v17  ;;  %v725_v29 = vadd.f32 %v724_v27, %v631_v17  ;;  %v731_v30 = vmax.f32 %v680_v22, 0.0  ;;  %v733_v0 = vmax.f32 %v723_v23, 0.0 }
 0x2a9   : > { %v732_v33 = vmax.f32 %v682_v28, 0.0  ;;  %v734_v34 = vmax.f32 %v725_v29, 0.0  ;;  %v736_v39 = vpack.c.bf16 %v731_v30, %v727_v35  ;;  %v738_v40 = vpack.c.bf16 %v733_v0, %v729_v36 }
 0x2ab   : > { %v737_v37 = vpack.c.bf16 %v732_v33, %v728_v31  ;;  %v739_v38 = vpack.c.bf16 %v734_v34, %v730_v32 }
 0x2ad   : > { %763 = vmatprep.subr.bf16.mxu0 %v737_v37  ;;  %804 = vmatprep.subr.bf16.mxu1 %v739_v38 }
 0x2ae   : > { %764 = vmatpush1.bf16.msra.mxu0 %v736_v39  ;;  %805 = vmatpush1.bf16.msra.mxu1 %v738_v40 }
 0x2b1   : > { %1029 = vmatmul.mubr.msk.bf16.vlgmr.msra.gmra.mxu0 %vm397_vm0, %v735_v41  ;;  %1030 = vmatmul.mubr.msk.bf16.vlgmr.msra.gmra.mxu1 %vm397_vm0, %v735_v41 }
 0x371   : > { %v783_v43 = vpop.f32.mrf.mxu0  ;;  %v824_v44 = vpop.f32.mrf.mxu1 }
 0x372   : > { %v1423_v45 = vadd.f32 %v783_v43, %v744_v42  ;;  %v1425_v46 = vadd.f32 %v824_v44, %v744_v42 }
 0x373   : > { %v785_v47 = vpop.f32.mrf.mxu0  ;;  %v826_v48 = vpop.f32.mrf.mxu1 }
 0x374   : > { %v832_v49 = vsel %vm831_vm1, %v1423_v45, -inf  ;;  %v846_v50 = vsel %vm831_vm1, %v1425_v46, -inf  ;;  %v1431_v51 = vadd.f32 %v785_v47, %v744_v42  ;;  %v1433_v52 = vadd.f32 %v826_v48, %v744_v42 }
 0x375   : > { %v833_v53 = vrot.slane %v832_v49, 4  ;;  %v847_v54 = vrot.slane %v846_v50, 4  ;;  %v787_v55 = vpop.f32.mrf.mxu0  ;;  %v828_v56 = vpop.f32.mrf.mxu1 }
 0x376   : > { %v839_v57 = vsel %vm831_vm1, %v1431_v51, -inf  ;;  %v853_v58 = vsel %vm831_vm1, %v1433_v52, -inf }
 0x377   : > { %v834_v59 = vmax.f32 %v832_v49, %v833_v53  ;;  %v848_v60 = vmax.f32 %v846_v50, %v847_v54  ;;  %v840_v61 = vrot.slane %v839_v57, 4  ;;  %v854_v62 = vrot.slane %v853_v58, 4  ;;  %v788_v63 = vpop.f32.mrf.mxu0  ;;  %v829_v1 = vpop.f32.mrf.mxu1 }
 0x379   : > { %v835_v2 = vrot.slane %v834_v59, 2  ;;  %v849_v3 = vrot.slane %v848_v60, 2  ;;  %v841_v4 = vmax.f32 %v839_v57, %v840_v61  ;;  %v855_v5 = vmax.f32 %v853_v58, %v854_v62 }
 0x37b   : > { %v836_v6 = vmax.f32 %v834_v59, %v835_v2  ;;  %v850_v7 = vmax.f32 %v848_v60, %v849_v3  ;;  %v842_v8 = vrot.slane %v841_v4, 2  ;;  %v856_v9 = vrot.slane %v855_v5, 2 }
 0x37d   : > { %v837_v10 = vrot.slane %v836_v6, 1  ;;  %v851_v11 = vrot.slane %v850_v7, 1  ;;  %v843_v12 = vmax.f32 %v841_v4, %v842_v8  ;;  %v857_v13 = vmax.f32 %v855_v5, %v856_v9 }
 0x37f   : > { %v838_v14 = vmax.f32 %v836_v6, %v837_v10  ;;  %v852_v15 = vmax.f32 %v850_v7, %v851_v11  ;;  %v844_v16 = vrot.slane %v843_v12, 1  ;;  %v858_v17 = vrot.slane %v857_v13, 1 }
 0x381   : > { %v860_v18 = vsub.f32 %v1423_v45, %v838_v14  ;;  %v862_v19 = vsub.f32 %v1425_v46, %v852_v15  ;;  %v845_v20 = vmax.f32 %v843_v12, %v844_v16  ;;  %v859_v21 = vmax.f32 %v857_v13, %v858_v17 }
 0x383   : > { %v864_v22 = vmul.f32 1.442695, %v860_v18  ;;  %v868_v23 = vmul.f32 1.442695, %v862_v19  ;;  %v861_v24 = vsub.f32 %v1431_v51, %v845_v20  ;;  %v863_v25 = vsub.f32 %v1433_v52, %v859_v21 }
 0x385   : > { %1099 = vpow2.f32 %v864_v22  ;;  %v866_v26 = vmul.f32 1.442695, %v861_v24  ;;  %v870_v27 = vmul.f32 1.442695, %v863_v25 }
 0x386   : > { %1101 = vpow2.f32 %v868_v23 }
 0x387   : > { %1103 = vpow2.f32 %v866_v26 }
 0x388   : > { %1105 = vpow2.f32 %v870_v27 }
 0x392   : > { %v1100_v28 = vpop.eup %1099 }
 0x393   : > { %v1102_v29 = vpop.eup %1101  ;;  %v872_v30 = vsel %vm831_vm1, %v1100_v28, 0.0 }
 0x394   : > { %v1104_v0 = vpop.eup %1103  ;;  %v873_v31 = vrot.slane %v872_v30, 4  ;;  %v886_v32 = vsel %vm831_vm1, %v1102_v29, 0.0 }
 0x395   : > { %v1106_v33 = vpop.eup %1105  ;;  %v887_v34 = vrot.slane %v886_v32, 4  ;;  %v879_v35 = vsel %vm831_vm1, %v1104_v0, 0.0 }
 0x396   : > { %v874_v36 = vadd.f32 %v873_v31, %v872_v30  ;;  %v880_v37 = vrot.slane %v879_v35, 4  ;;  %v893_v38 = vsel %vm831_vm1, %v1106_v33, 0.0 }
 0x397   : > { %v888_v39 = vadd.f32 %v887_v34, %v886_v32  ;;  %v894_v40 = vrot.slane %v893_v38, 4 }
 0x398   : > { %v875_v41 = vrot.slane %v874_v36, 2  ;;  %v881_v42 = vadd.f32 %v880_v37, %v879_v35 }
 0x399   : > { %v889_v43 = vrot.slane %v888_v39, 2  ;;  %v895_v44 = vadd.f32 %v894_v40, %v893_v38 }
 0x39a   : > { %v876_v47 = vadd.f32 %v875_v41, %v874_v36  ;;  %v882_v48 = vrot.slane %v881_v42, 2 }
 0x39b   : > { %v890_v49 = vadd.f32 %v889_v43, %v888_v39  ;;  %v896_v50 = vrot.slane %v895_v44, 2 }
 0x39c   : > { %v877_v53 = vrot.slane %v876_v47, 1  ;;  %v883_v54 = vadd.f32 %v882_v48, %v881_v42 }
 0x39d   : > { %v891_v55 = vrot.slane %v890_v49, 1  ;;  %v897_v56 = vadd.f32 %v896_v50, %v895_v44 }
 0x39e   : > { %v878_v57 = vadd.f32 %v877_v53, %v876_v47  ;;  %v884_v58 = vrot.slane %v883_v54, 1 }
 0x39f   : > { %v892_v59 = vadd.f32 %v891_v55, %v890_v49  ;;  %v898_v60 = vrot.slane %v897_v56, 1 }
 0x3a0   : > { %1107 = vrcp.f32 %v878_v57  ;;  %v885_v61 = vadd.f32 %v884_v58, %v883_v54 }
 0x3a1   : > { %1109 = vrcp.f32 %v892_v59  ;;  %v899_v62 = vadd.f32 %v898_v60, %v897_v56 }
 0x3a2   : > { %1111 = vrcp.f32 %v885_v61 }
 0x3a3   : > { %1113 = vrcp.f32 %v899_v62 }
 0x3ad   : > { %v1108_v63 = vpop.eup %1107 }
 0x3ae   : > { %v1110_v1 = vpop.eup %1109  ;;  %v904_v2 = vmul.f32 %v1108_v63, %v1100_v28 }
 0x3af   : > { %v1112_v3 = vpop.eup %1111  ;;  %v906_v4 = vmul.f32 %v1110_v1, %v1102_v29 }
 0x3b0   : > { %v1114_v5 = vpop.eup %1113  ;;  %v905_v6 = vmul.f32 %v1112_v3, %v1104_v0  ;;  %v908_v8 = vsel %vm831_vm1, %v904_v2, %v1423_v45 }
 0x3b1   : > { %v907_v7 = vmul.f32 %v1114_v5, %v1106_v33  ;;  %v910_v10 = vsel %vm831_vm1, %v906_v4, %v1425_v46 }
 0x3b2   : > { %v909_v9 = vsel %vm831_vm1, %v905_v6, %v1431_v51 }
 0x3b3   : > { %v916_v11 = vcombine.low %v908_v8, %v909_v9  ;;  %v911_v12 = vsel %vm831_vm1, %v907_v7, %v1433_v52 }
 0x3b4   : > { %v917_v13 = vcombine.low %v910_v10, %v911_v12 }
 0x3b5   : > { %920 = vst [vmem:[%s350_s27] sm:$0xff] %v916_v11 }
 0x3b6   : > { %921 = vst [vmem:[%s350_s27 + $0x8] sm:$0xff] %v917_v13 }
 0x3b7   : > { %1156 = shalt.err (!%p1153_p10)
}
 0x3b8   : > { %s1157_s18 = scalar_lea.hbm %s1460_s13, 256  ;;  %s1161_s19 = scalar_lea.hbm %s1506_s9, 512 }
 0x3b9   : > { %p1158_p1 = scmp.ne.s32.totalorder %s1460_s13, %s1157_s18  ;;  %p1162_p0 = scmp.lt.s32.totalorder %s1460_s13, %s1506_s9 }
 0x3ba   : > { %p1163_p2 = scmp.lt.s32.totalorder %s1161_s19, %s1157_s18 }
 0x3bb   : > { %p1159_p3 = pnand %p1158_p1, %p1519_p12 }
 0x3bc   : > { %p1164_p6 = por %p1163_p2, %p1162_p0 }
 0x3bd   : > { %p1160_p9 = pneg %p1159_p3 }
 0x3bf   : > { %p1165_p11 = pnand %p1164_p6, %p1160_p9 }
 0x3c1   : > { %1168 = shalt.err (!%p1165_p11)
}
 0x3c2   : > { %1040 = dma.vmem_to_hbm [thread:$0]  (%p1519_p12), %s938_s23, 256, %s1460_s13, %s923_s20  }
 0x3c3 PF: > { %s949_s28 = sand.u32 1, %s1195_s30   ;;  %p1520_p13 = scmp.ne.s32.totalorder %s1515_s22, 0 }
 0x3c4   : > { %p1521_p4 = scmp.ge.s32.totalorder %s1207_s12, 2  ;;  %s950_s14 = scalar_lea.sflag [#allocation4], %s949_s28 }
 0x3c6   : > { %p1047_p5 = pnand %p1521_p4, %p1520_p13 }
 0x3c8   : > { %p1048_p7 = pneg %p1047_p5 }
 0x3ca   : > { %1190 = dma.done.wait (%p1048_p7), %s950_s14, 256  }
 0x3cb   : > { %1192 = vsyncadd (%p1048_p7), %s950_s14, 4294967040  ;;  %s1522_s16 = sld [smem:[#allocation8_spill]]  ;;  %p22_p8 = scmp.ge.s32.totalorder %s1290_s15, 4  }
 0x3cc   : > { %s1523_s11 = sld [smem:[#allocation9_spill]]  ;;  %s1524_s30 = smov %s1199_s10 }
 0x3cd   : > { %s1526_s12 = smov %s1290_s15  ;;  %24 = sbr.rel (!%p22_p8) target bundleno = 5 (0x5), region = 101 }
 0x3d1   : > { %s1525_s10 = smov %s1522_s16 }
 0x3d2   :  { %955 = vsyncpa [#allocation3], 1 }
 0x3d3   :  { %957 = vsyncpa [#allocation3 + $0x1], 1 }
 0x3d4   :  { %958 = vsyncpa [#allocation4], 1 }
 0x3d5   :  { %960 = vsyncpa [#allocation4 + $0x1], 1 }

</bundles_post_ra>
